<compile_context>
chip_gen: v7x
topology: tpu7x:2x2x1
jax: 0.10.0
libtpu: 0.0.40
codegen_flags: <defaults>
</compile_context>

<pallas_src>
import jax
import jax.numpy as jnp
from jax import lax
from jax.experimental import pallas as pl
from jax.experimental.pallas import tpu as pltpu


def lstm_encoder_kernel(x_ref, wih_ref, whh_ref, b_ref, wa_ref, ba_ref,
                        act_ref, hn_ref, cn_ref,
                        pre_scr, hall_scr):
    """Single-invocation kernel: sequential LSTM over time + linear head.

    Everything fits in VMEM (<100 KiB), so no grid / BlockSpec tiling is used.
    Gate column order inside the kernel is (i, f, o, g) — permuted in wrapper.
    """
    H = hn_ref.shape[1]
    R = x_ref.shape[0]

    # --- hoisted input projection: one batched matmul for all timesteps -----
    pre_scr[...] = (
        jnp.dot(x_ref[...], wih_ref[...], preferred_element_type=jnp.float32)
        + b_ref[...])                                        # (R, 4H)

    h0 = jnp.zeros((1, H), jnp.float32)                      # matches init_hidden()
    c0 = jnp.zeros((1, H), jnp.float32)

    def step(t, carry):
        h, c = carry
        # only the recurrent matmul remains on the serial critical path
        gates = (pre_scr[pl.ds(t, 1), :]
                 + jnp.dot(h, whh_ref[...],
                           preferred_element_type=jnp.float32))   # (1, 4H)
        sig = jax.nn.sigmoid(gates[:, :3 * H])               # i | f | o in one EUP pass
        i_g = sig[:, 0 * H:1 * H]
        f_g = sig[:, 1 * H:2 * H]
        o_g = sig[:, 2 * H:3 * H]
        g_g = jnp.tanh(gates[:, 3 * H:4 * H])
        c_new = f_g * c + i_g * g_g
        h_new = o_g * jnp.tanh(c_new)
        hall_scr[pl.ds(t, 1), :] = h_new
        return (h_new, c_new)

    h_n, c_n = lax.fori_loop(0, R, step, (h0, c0), unroll=True)

    hn_ref[...] = h_n
    cn_ref[...] = c_n

    # --- hoisted hiddenToAction head: one matmul + one lane-dense store -----
    act_ref[...] = (
        jnp.dot(hall_scr[...], wa_ref[...], preferred_element_type=jnp.float32)
        + ba_ref[...])


@jax.jit
def lstm_encoder_forward(x, w_ih, w_hh, b_ih, b_hh, w_act, b_act):
    """Takes raw PyTorch-layout parameters and returns (action_scores, (h, c))."""
    R, _ = x.shape
    H = w_hh.shape[1]
    A = w_act.shape[0]
    A_pad = ((A + 127) // 128) * 128                         # lane-dense output

    # gate-column permutation (i, f, g, o) -> (i, f, o, g), applied consistently
    perm = jnp.concatenate([
        jnp.arange(0 * H, 1 * H),
        jnp.arange(1 * H, 2 * H),
        jnp.arange(3 * H, 4 * H),
        jnp.arange(2 * H, 3 * H),
    ])
    w_ih_t = jnp.transpose(w_ih)[:, perm]                    # (in, 4H)
    w_hh_t = jnp.transpose(w_hh)[:, perm]                    # (H, 4H)
    bias = (b_ih + b_hh)[perm][None, :]                      # (1, 4H)

    # action head, transposed + zero-padded to 128 lanes
    w_act_t = jnp.zeros((H, A_pad), jnp.float32).at[:, :A].set(jnp.transpose(w_act))
    b_act_p = jnp.zeros((1, A_pad), jnp.float32).at[:, :A].set(b_act[None, :])

    vmem = pl.BlockSpec(memory_space=pltpu.MemorySpace.VMEM)
    actions_pad, h_n, c_n = pl.pallas_call(
        lstm_encoder_kernel,
        out_shape=(
            jax.ShapeDtypeStruct((R, A_pad), jnp.float32),   # padded action scores
            jax.ShapeDtypeStruct((1, H), jnp.float32),       # h_n
            jax.ShapeDtypeStruct((1, H), jnp.float32),       # c_n
        ),
        in_specs=[vmem] * 6,
        out_specs=(vmem, vmem, vmem),
        scratch_shapes=[
            pltpu.VMEM((R, 4 * H), jnp.float32),             # pre-computed gates
            pltpu.VMEM((R, H), jnp.float32),                 # all hidden states
        ],
    )(x, w_ih_t, w_hh_t, bias, w_act_t, b_act_p)

    actions = actions_pad[:, :A]
    # PyTorch hidden tuple has shape (1, 1, hidden_dim) each
    return actions, (h_n.reshape(1, 1, H), c_n.reshape(1, 1, H))


def jax_reference(x, w_ih, w_hh, b_ih, b_hh, w_act, b_act):
    """Pure-JAX reference with PyTorch LSTM semantics (gate order i, f, g, o)."""
    H = w_hh.shape[1]

    def step(carry, xt):
        h, c = carry
        gates = xt @ w_ih.T + h @ w_hh.T + b_ih + b_hh       # (4H,)
        i_g = jax.nn.sigmoid(gates[0 * H:1 * H])
        f_g = jax.nn.sigmoid(gates[1 * H:2 * H])
        g_g = jnp.tanh(gates[2 * H:3 * H])
        o_g = jax.nn.sigmoid(gates[3 * H:4 * H])
        c_new = f_g * c + i_g * g_g
        h_new = o_g * jnp.tanh(c_new)
        return (h_new, c_new), h_new

    h0 = jnp.zeros((H,), jnp.float32)
    c0 = jnp.zeros((H,), jnp.float32)
    (h_n, c_n), hs = lax.scan(step, (h0, c0), x)
    actions = hs @ w_act.T + b_act
    return actions, (h_n, c_n)


if __name__ == "__main__":
    input_dim, hidden_dim, num_actions, rollout_dim = 16, 32, 8, 8

    key = jax.random.PRNGKey(0)
    ks = jax.random.split(key, 8)
    bound = 1.0 / jnp.sqrt(hidden_dim)

    # PyTorch LSTM params: weight_ih (4H, in), weight_hh (4H, H), bias_ih/hh (4H,)
    w_ih = jax.random.uniform(ks[0], (4 * hidden_dim, input_dim), jnp.float32,
                              -bound, bound)
    w_hh = jax.random.uniform(ks[1], (4 * hidden_dim, hidden_dim), jnp.float32,
                              -bound, bound)
    b_ih = jax.random.uniform(ks[2], (4 * hidden_dim,), jnp.float32, -bound, bound)
    b_hh = jax.random.uniform(ks[3], (4 * hidden_dim,), jnp.float32, -bound, bound)
    # hiddenToAction Linear: weight (A, H), bias (A,)
    w_act = jax.random.uniform(ks[4], (num_actions, hidden_dim), jnp.float32,
                               -bound, bound)
    b_act = jax.random.uniform(ks[5], (num_actions,), jnp.float32, -bound, bound)

    # input "sequence" -> view(rollout_dim, 1, -1) means (rollout_dim, input_dim)
    x = jax.random.normal(ks[6], (rollout_dim, input_dim), jnp.float32)

    actions, (h_n, c_n) = lstm_encoder_forward(x, w_ih, w_hh, b_ih, b_hh,
                                               w_act, b_act)
    jax.block_until_ready(actions)

    ref_actions, (ref_h, ref_c) = jax_reference(x, w_ih, w_hh, b_ih, b_hh,
                                                w_act, b_act)
    assert jnp.allclose(actions, ref_actions, atol=1e-5, rtol=1e-5)
    assert jnp.allclose(h_n.reshape(-1), ref_h.reshape(-1), atol=1e-5, rtol=1e-5)
    assert jnp.allclose(c_n.reshape(-1), ref_c.reshape(-1), atol=1e-5, rtol=1e-5)

    print("KERNEL_OK")
</pallas_src>

<mosaic_0001>
module attributes {stable_mosaic.version = 11 : i64} {
  func.func @lstm_encoder_kernel(%arg0: memref<8x16xf32, #tpu.memory_space<vmem>>, %arg1: memref<16x128xf32, #tpu.memory_space<vmem>>, %arg2: memref<32x128xf32, #tpu.memory_space<vmem>>, %arg3: memref<1x128xf32, #tpu.memory_space<vmem>>, %arg4: memref<32x128xf32, #tpu.memory_space<vmem>>, %arg5: memref<1x128xf32, #tpu.memory_space<vmem>>, %arg6: memref<8x128xf32, #tpu.memory_space<vmem>>, %arg7: memref<1x32xf32, #tpu.memory_space<vmem>>, %arg8: memref<1x32xf32, #tpu.memory_space<vmem>>, %arg9: memref<8x128xf32, #tpu.memory_space<vmem>>, %arg10: memref<8x32xf32, #tpu.memory_space<vmem>>) attributes {dimension_semantics = [], scalar_prefetch = 0 : i64, scratch_operands = 2 : i64, tpu.core_type = #tpu.core_type<tc>} {
    %c0 = arith.constant 0 : index
    %c0_0 = arith.constant 0 : index
    %0 = vector.load %arg0[%c0, %c0_0] : memref<8x16xf32, #tpu.memory_space<vmem>>, vector<8x16xf32>
    %c0_1 = arith.constant 0 : index
    %c0_2 = arith.constant 0 : index
    %1 = vector.load %arg1[%c0_1, %c0_2] : memref<16x128xf32, #tpu.memory_space<vmem>>, vector<16x128xf32>
    %cst = arith.constant dense<0.000000e+00> : vector<8x128xf32>
    %2 = tpu.matmul %0, %1, %cst {dimension_numbers = #tpu.dot_dimension_numbers<[1], [0], [0], [1], [0, 0, 1, 1], [], []>} : vector<8x16xf32>, vector<16x128xf32>, vector<8x128xf32> -> vector<8x128xf32>
    %c0_3 = arith.constant 0 : index
    %c0_4 = arith.constant 0 : index
    %3 = vector.load %arg3[%c0_3, %c0_4] : memref<1x128xf32, #tpu.memory_space<vmem>>, vector<1x128xf32>
    %4 = vector.broadcast %3 : vector<1x128xf32> to vector<8x128xf32>
    %5 = arith.addf %2, %4 : vector<8x128xf32>
    %c0_5 = arith.constant 0 : index
    %c0_6 = arith.constant 0 : index
    %6 = vector.load %arg9[%c0_5, %c0_6] : memref<8x128xf32, #tpu.memory_space<vmem>>, vector<8x128xf32>
    tpu.vector_store %arg9[%c0_5, %c0_6], %5 {strides = array<i32>} : memref<8x128xf32, #tpu.memory_space<vmem>>, vector<8x128xf32>,
    %cst_7 = arith.constant 0.000000e+00 : f32
    %7 = vector.broadcast %cst_7 : f32 to vector<1x32xf32>
    %cst_8 = arith.constant 0.000000e+00 : f32
    %8 = vector.broadcast %cst_8 : f32 to vector<1x32xf32>
    %c0_i32 = arith.constant 0 : i32
    %9 = arith.index_cast %c0_i32 : i32 to index
    %c0_9 = arith.constant 0 : index
    %10 = vector.load %arg9[%9, %c0_9] : memref<8x128xf32, #tpu.memory_space<vmem>>, vector<1x128xf32>
    %c0_10 = arith.constant 0 : index
    %c0_11 = arith.constant 0 : index
    %11 = vector.load %arg2[%c0_10, %c0_11] : memref<32x128xf32, #tpu.memory_space<vmem>>, vector<32x128xf32>
    %cst_12 = arith.constant dense<0.000000e+00> : vector<1x128xf32>
    %12 = tpu.matmul %7, %11, %cst_12 {dimension_numbers = #tpu.dot_dimension_numbers<[1], [0], [0], [1], [0, 0, 1, 1], [], []>} : vector<1x32xf32>, vector<32x128xf32>, vector<1x128xf32> -> vector<1x128xf32>
    %13 = arith.addf %10, %12 : vector<1x128xf32>
    %14 = vector.extract_strided_slice %13 {offsets = [0, 0], sizes = [1, 96], strides = [1, 1]} : vector<1x128xf32> to vector<1x96xf32>
    %15 = arith.negf %14 : vector<1x96xf32>
    %16 = math.exp %15 : vector<1x96xf32>
    %cst_13 = arith.constant 1.000000e+00 : f32
    %17 = vector.broadcast %cst_13 : f32 to vector<1x96xf32>
    %18 = arith.addf %17, %16 : vector<1x96xf32>
    %19 = arith.divf %17, %18 : vector<1x96xf32>
    %20 = vector.extract_strided_slice %19 {offsets = [0, 0], sizes = [1, 32], strides = [1, 1]} : vector<1x96xf32> to vector<1x32xf32>
    %21 = vector.extract_strided_slice %19 {offsets = [0, 32], sizes = [1, 32], strides = [1, 1]} : vector<1x96xf32> to vector<1x32xf32>
    %22 = vector.extract_strided_slice %19 {offsets = [0, 64], sizes = [1, 32], strides = [1, 1]} : vector<1x96xf32> to vector<1x32xf32>
    %23 = vector.extract_strided_slice %13 {offsets = [0, 96], sizes = [1, 32], strides = [1, 1]} : vector<1x128xf32> to vector<1x32xf32>
    %24 = math.tanh %23 : vector<1x32xf32>
    %25 = arith.mulf %21, %8 : vector<1x32xf32>
    %26 = arith.mulf %20, %24 : vector<1x32xf32>
    %27 = arith.addf %25, %26 : vector<1x32xf32>
    %28 = math.tanh %27 : vector<1x32xf32>
    %29 = arith.mulf %22, %28 : vector<1x32xf32>
    %30 = arith.index_cast %c0_i32 : i32 to index
    %c0_14 = arith.constant 0 : index
    %31 = vector.load %arg10[%30, %c0_14] : memref<8x32xf32, #tpu.memory_space<vmem>>, vector<1x32xf32>
    tpu.vector_store %arg10[%30, %c0_14], %29 {strides = array<i32>} : memref<8x32xf32, #tpu.memory_space<vmem>>, vector<1x32xf32>,
    %c1_i32 = arith.constant 1 : i32
    %32 = arith.index_cast %c1_i32 : i32 to index
    %c0_15 = arith.constant 0 : index
    %33 = vector.load %arg9[%32, %c0_15] : memref<8x128xf32, #tpu.memory_space<vmem>>, vector<1x128xf32>
    %c0_16 = arith.constant 0 : index
    %c0_17 = arith.constant 0 : index
    %34 = vector.load %arg2[%c0_16, %c0_17] : memref<32x128xf32, #tpu.memory_space<vmem>>, vector<32x128xf32>
    %cst_18 = arith.constant dense<0.000000e+00> : vector<1x128xf32>
    %35 = tpu.matmul %29, %34, %cst_18 {dimension_numbers = #tpu.dot_dimension_numbers<[1], [0], [0], [1], [0, 0, 1, 1], [], []>} : vector<1x32xf32>, vector<32x128xf32>, vector<1x128xf32> -> vector<1x128xf32>
    %36 = arith.addf %33, %35 : vector<1x128xf32>
    %37 = vector.extract_strided_slice %36 {offsets = [0, 0], sizes = [1, 96], strides = [1, 1]} : vector<1x128xf32> to vector<1x96xf32>
    %38 = arith.negf %37 : vector<1x96xf32>
    %39 = math.exp %38 : vector<1x96xf32>
    %cst_19 = arith.constant 1.000000e+00 : f32
    %40 = vector.broadcast %cst_19 : f32 to vector<1x96xf32>
    %41 = arith.addf %40, %39 : vector<1x96xf32>
    %42 = arith.divf %40, %41 : vector<1x96xf32>
    %43 = vector.extract_strided_slice %42 {offsets = [0, 0], sizes = [1, 32], strides = [1, 1]} : vector<1x96xf32> to vector<1x32xf32>
    %44 = vector.extract_strided_slice %42 {offsets = [0, 32], sizes = [1, 32], strides = [1, 1]} : vector<1x96xf32> to vector<1x32xf32>
    %45 = vector.extract_strided_slice %42 {offsets = [0, 64], sizes = [1, 32], strides = [1, 1]} : vector<1x96xf32> to vector<1x32xf32>
    %46 = vector.extract_strided_slice %36 {offsets = [0, 96], sizes = [1, 32], strides = [1, 1]} : vector<1x128xf32> to vector<1x32xf32>
    %47 = math.tanh %46 : vector<1x32xf32>
    %48 = arith.mulf %44, %27 : vector<1x32xf32>
    %49 = arith.mulf %43, %47 : vector<1x32xf32>
    %50 = arith.addf %48, %49 : vector<1x32xf32>
    %51 = math.tanh %50 : vector<1x32xf32>
    %52 = arith.mulf %45, %51 : vector<1x32xf32>
    %53 = arith.index_cast %c1_i32 : i32 to index
    %c0_20 = arith.constant 0 : index
    %54 = vector.load %arg10[%53, %c0_20] : memref<8x32xf32, #tpu.memory_space<vmem>>, vector<1x32xf32>
    tpu.vector_store %arg10[%53, %c0_20], %52 {strides = array<i32>} : memref<8x32xf32, #tpu.memory_space<vmem>>, vector<1x32xf32>,
    %c2_i32 = arith.constant 2 : i32
    %55 = arith.index_cast %c2_i32 : i32 to index
    %c0_21 = arith.constant 0 : index
    %56 = vector.load %arg9[%55, %c0_21] : memref<8x128xf32, #tpu.memory_space<vmem>>, vector<1x128xf32>
    %c0_22 = arith.constant 0 : index
    %c0_23 = arith.constant 0 : index
    %57 = vector.load %arg2[%c0_22, %c0_23] : memref<32x128xf32, #tpu.memory_space<vmem>>, vector<32x128xf32>
    %cst_24 = arith.constant dense<0.000000e+00> : vector<1x128xf32>
    %58 = tpu.matmul %52, %57, %cst_24 {dimension_numbers = #tpu.dot_dimension_numbers<[1], [0], [0], [1], [0, 0, 1, 1], [], []>} : vector<1x32xf32>, vector<32x128xf32>, vector<1x128xf32> -> vector<1x128xf32>
    %59 = arith.addf %56, %58 : vector<1x128xf32>
    %60 = vector.extract_strided_slice %59 {offsets = [0, 0], sizes = [1, 96], strides = [1, 1]} : vector<1x128xf32> to vector<1x96xf32>
    %61 = arith.negf %60 : vector<1x96xf32>
    %62 = math.exp %61 : vector<1x96xf32>
    %cst_25 = arith.constant 1.000000e+00 : f32
    %63 = vector.broadcast %cst_25 : f32 to vector<1x96xf32>
    %64 = arith.addf %63, %62 : vector<1x96xf32>
    %65 = arith.divf %63, %64 : vector<1x96xf32>
    %66 = vector.extract_strided_slice %65 {offsets = [0, 0], sizes = [1, 32], strides = [1, 1]} : vector<1x96xf32> to vector<1x32xf32>
    %67 = vector.extract_strided_slice %65 {offsets = [0, 32], sizes = [1, 32], strides = [1, 1]} : vector<1x96xf32> to vector<1x32xf32>
    %68 = vector.extract_strided_slice %65 {offsets = [0, 64], sizes = [1, 32], strides = [1, 1]} : vector<1x96xf32> to vector<1x32xf32>
    %69 = vector.extract_strided_slice %59 {offsets = [0, 96], sizes = [1, 32], strides = [1, 1]} : vector<1x128xf32> to vector<1x32xf32>
    %70 = math.tanh %69 : vector<1x32xf32>
    %71 = arith.mulf %67, %50 : vector<1x32xf32>
    %72 = arith.mulf %66, %70 : vector<1x32xf32>
    %73 = arith.addf %71, %72 : vector<1x32xf32>
    %74 = math.tanh %73 : vector<1x32xf32>
    %75 = arith.mulf %68, %74 : vector<1x32xf32>
    %76 = arith.index_cast %c2_i32 : i32 to index
    %c0_26 = arith.constant 0 : index
    %77 = vector.load %arg10[%76, %c0_26] : memref<8x32xf32, #tpu.memory_space<vmem>>, vector<1x32xf32>
    tpu.vector_store %arg10[%76, %c0_26], %75 {strides = array<i32>} : memref<8x32xf32, #tpu.memory_space<vmem>>, vector<1x32xf32>,
    %c3_i32 = arith.constant 3 : i32
    %78 = arith.index_cast %c3_i32 : i32 to index
    %c0_27 = arith.constant 0 : index
    %79 = vector.load %arg9[%78, %c0_27] : memref<8x128xf32, #tpu.memory_space<vmem>>, vector<1x128xf32>
    %c0_28 = arith.constant 0 : index
    %c0_29 = arith.constant 0 : index
    %80 = vector.load %arg2[%c0_28, %c0_29] : memref<32x128xf32, #tpu.memory_space<vmem>>, vector<32x128xf32>
    %cst_30 = arith.constant dense<0.000000e+00> : vector<1x128xf32>
    %81 = tpu.matmul %75, %80, %cst_30 {dimension_numbers = #tpu.dot_dimension_numbers<[1], [0], [0], [1], [0, 0, 1, 1], [], []>} : vector<1x32xf32>, vector<32x128xf32>, vector<1x128xf32> -> vector<1x128xf32>
    %82 = arith.addf %79, %81 : vector<1x128xf32>
    %83 = vector.extract_strided_slice %82 {offsets = [0, 0], sizes = [1, 96], strides = [1, 1]} : vector<1x128xf32> to vector<1x96xf32>
    %84 = arith.negf %83 : vector<1x96xf32>
    %85 = math.exp %84 : vector<1x96xf32>
    %cst_31 = arith.constant 1.000000e+00 : f32
    %86 = vector.broadcast %cst_31 : f32 to vector<1x96xf32>
    %87 = arith.addf %86, %85 : vector<1x96xf32>
    %88 = arith.divf %86, %87 : vector<1x96xf32>
    %89 = vector.extract_strided_slice %88 {offsets = [0, 0], sizes = [1, 32], strides = [1, 1]} : vector<1x96xf32> to vector<1x32xf32>
    %90 = vector.extract_strided_slice %88 {offsets = [0, 32], sizes = [1, 32], strides = [1, 1]} : vector<1x96xf32> to vector<1x32xf32>
    %91 = vector.extract_strided_slice %88 {offsets = [0, 64], sizes = [1, 32], strides = [1, 1]} : vector<1x96xf32> to vector<1x32xf32>
    %92 = vector.extract_strided_slice %82 {offsets = [0, 96], sizes = [1, 32], strides = [1, 1]} : vector<1x128xf32> to vector<1x32xf32>
    %93 = math.tanh %92 : vector<1x32xf32>
    %94 = arith.mulf %90, %73 : vector<1x32xf32>
    %95 = arith.mulf %89, %93 : vector<1x32xf32>
    %96 = arith.addf %94, %95 : vector<1x32xf32>
    %97 = math.tanh %96 : vector<1x32xf32>
    %98 = arith.mulf %91, %97 : vector<1x32xf32>
    %99 = arith.index_cast %c3_i32 : i32 to index
    %c0_32 = arith.constant 0 : index
    %100 = vector.load %arg10[%99, %c0_32] : memref<8x32xf32, #tpu.memory_space<vmem>>, vector<1x32xf32>
    tpu.vector_store %arg10[%99, %c0_32], %98 {strides = array<i32>} : memref<8x32xf32, #tpu.memory_space<vmem>>, vector<1x32xf32>,
    %c4_i32 = arith.constant 4 : i32
    %101 = arith.index_cast %c4_i32 : i32 to index
    %c0_33 = arith.constant 0 : index
    %102 = vector.load %arg9[%101, %c0_33] : memref<8x128xf32, #tpu.memory_space<vmem>>, vector<1x128xf32>
    %c0_34 = arith.constant 0 : index
    %c0_35 = arith.constant 0 : index
    %103 = vector.load %arg2[%c0_34, %c0_35] : memref<32x128xf32, #tpu.memory_space<vmem>>, vector<32x128xf32>
    %cst_36 = arith.constant dense<0.000000e+00> : vector<1x128xf32>
    %104 = tpu.matmul %98, %103, %cst_36 {dimension_numbers = #tpu.dot_dimension_numbers<[1], [0], [0], [1], [0, 0, 1, 1], [], []>} : vector<1x32xf32>, vector<32x128xf32>, vector<1x128xf32> -> vector<1x128xf32>
    %105 = arith.addf %102, %104 : vector<1x128xf32>
    %106 = vector.extract_strided_slice %105 {offsets = [0, 0], sizes = [1, 96], strides = [1, 1]} : vector<1x128xf32> to vector<1x96xf32>
    %107 = arith.negf %106 : vector<1x96xf32>
    %108 = math.exp %107 : vector<1x96xf32>
    %cst_37 = arith.constant 1.000000e+00 : f32
    %109 = vector.broadcast %cst_37 : f32 to vector<1x96xf32>
    %110 = arith.addf %109, %108 : vector<1x96xf32>
    %111 = arith.divf %109, %110 : vector<1x96xf32>
    %112 = vector.extract_strided_slice %111 {offsets = [0, 0], sizes = [1, 32], strides = [1, 1]} : vector<1x96xf32> to vector<1x32xf32>
    %113 = vector.extract_strided_slice %111 {offsets = [0, 32], sizes = [1, 32], strides = [1, 1]} : vector<1x96xf32> to vector<1x32xf32>
    %114 = vector.extract_strided_slice %111 {offsets = [0, 64], sizes = [1, 32], strides = [1, 1]} : vector<1x96xf32> to vector<1x32xf32>
    %115 = vector.extract_strided_slice %105 {offsets = [0, 96], sizes = [1, 32], strides = [1, 1]} : vector<1x128xf32> to vector<1x32xf32>
    %116 = math.tanh %115 : vector<1x32xf32>
    %117 = arith.mulf %113, %96 : vector<1x32xf32>
    %118 = arith.mulf %112, %116 : vector<1x32xf32>
    %119 = arith.addf %117, %118 : vector<1x32xf32>
    %120 = math.tanh %119 : vector<1x32xf32>
    %121 = arith.mulf %114, %120 : vector<1x32xf32>
    %122 = arith.index_cast %c4_i32 : i32 to index
    %c0_38 = arith.constant 0 : index
    %123 = vector.load %arg10[%122, %c0_38] : memref<8x32xf32, #tpu.memory_space<vmem>>, vector<1x32xf32>
    tpu.vector_store %arg10[%122, %c0_38], %121 {strides = array<i32>} : memref<8x32xf32, #tpu.memory_space<vmem>>, vector<1x32xf32>,
    %c5_i32 = arith.constant 5 : i32
    %124 = arith.index_cast %c5_i32 : i32 to index
    %c0_39 = arith.constant 0 : index
    %125 = vector.load %arg9[%124, %c0_39] : memref<8x128xf32, #tpu.memory_space<vmem>>, vector<1x128xf32>
    %c0_40 = arith.constant 0 : index
    %c0_41 = arith.constant 0 : index
    %126 = vector.load %arg2[%c0_40, %c0_41] : memref<32x128xf32, #tpu.memory_space<vmem>>, vector<32x128xf32>
    %cst_42 = arith.constant dense<0.000000e+00> : vector<1x128xf32>
    %127 = tpu.matmul %121, %126, %cst_42 {dimension_numbers = #tpu.dot_dimension_numbers<[1], [0], [0], [1], [0, 0, 1, 1], [], []>} : vector<1x32xf32>, vector<32x128xf32>, vector<1x128xf32> -> vector<1x128xf32>
    %128 = arith.addf %125, %127 : vector<1x128xf32>
    %129 = vector.extract_strided_slice %128 {offsets = [0, 0], sizes = [1, 96], strides = [1, 1]} : vector<1x128xf32> to vector<1x96xf32>
    %130 = arith.negf %129 : vector<1x96xf32>
    %131 = math.exp %130 : vector<1x96xf32>
    %cst_43 = arith.constant 1.000000e+00 : f32
    %132 = vector.broadcast %cst_43 : f32 to vector<1x96xf32>
    %133 = arith.addf %132, %131 : vector<1x96xf32>
    %134 = arith.divf %132, %133 : vector<1x96xf32>
    %135 = vector.extract_strided_slice %134 {offsets = [0, 0], sizes = [1, 32], strides = [1, 1]} : vector<1x96xf32> to vector<1x32xf32>
    %136 = vector.extract_strided_slice %134 {offsets = [0, 32], sizes = [1, 32], strides = [1, 1]} : vector<1x96xf32> to vector<1x32xf32>
    %137 = vector.extract_strided_slice %134 {offsets = [0, 64], sizes = [1, 32], strides = [1, 1]} : vector<1x96xf32> to vector<1x32xf32>
    %138 = vector.extract_strided_slice %128 {offsets = [0, 96], sizes = [1, 32], strides = [1, 1]} : vector<1x128xf32> to vector<1x32xf32>
    %139 = math.tanh %138 : vector<1x32xf32>
    %140 = arith.mulf %136, %119 : vector<1x32xf32>
    %141 = arith.mulf %135, %139 : vector<1x32xf32>
    %142 = arith.addf %140, %141 : vector<1x32xf32>
    %143 = math.tanh %142 : vector<1x32xf32>
    %144 = arith.mulf %137, %143 : vector<1x32xf32>
    %145 = arith.index_cast %c5_i32 : i32 to index
    %c0_44 = arith.constant 0 : index
    %146 = vector.load %arg10[%145, %c0_44] : memref<8x32xf32, #tpu.memory_space<vmem>>, vector<1x32xf32>
    tpu.vector_store %arg10[%145, %c0_44], %144 {strides = array<i32>} : memref<8x32xf32, #tpu.memory_space<vmem>>, vector<1x32xf32>,
    %c6_i32 = arith.constant 6 : i32
    %147 = arith.index_cast %c6_i32 : i32 to index
    %c0_45 = arith.constant 0 : index
    %148 = vector.load %arg9[%147, %c0_45] : memref<8x128xf32, #tpu.memory_space<vmem>>, vector<1x128xf32>
    %c0_46 = arith.constant 0 : index
    %c0_47 = arith.constant 0 : index
    %149 = vector.load %arg2[%c0_46, %c0_47] : memref<32x128xf32, #tpu.memory_space<vmem>>, vector<32x128xf32>
    %cst_48 = arith.constant dense<0.000000e+00> : vector<1x128xf32>
    %150 = tpu.matmul %144, %149, %cst_48 {dimension_numbers = #tpu.dot_dimension_numbers<[1], [0], [0], [1], [0, 0, 1, 1], [], []>} : vector<1x32xf32>, vector<32x128xf32>, vector<1x128xf32> -> vector<1x128xf32>
    %151 = arith.addf %148, %150 : vector<1x128xf32>
    %152 = vector.extract_strided_slice %151 {offsets = [0, 0], sizes = [1, 96], strides = [1, 1]} : vector<1x128xf32> to vector<1x96xf32>
    %153 = arith.negf %152 : vector<1x96xf32>
    %154 = math.exp %153 : vector<1x96xf32>
    %cst_49 = arith.constant 1.000000e+00 : f32
    %155 = vector.broadcast %cst_49 : f32 to vector<1x96xf32>
    %156 = arith.addf %155, %154 : vector<1x96xf32>
    %157 = arith.divf %155, %156 : vector<1x96xf32>
    %158 = vector.extract_strided_slice %157 {offsets = [0, 0], sizes = [1, 32], strides = [1, 1]} : vector<1x96xf32> to vector<1x32xf32>
    %159 = vector.extract_strided_slice %157 {offsets = [0, 32], sizes = [1, 32], strides = [1, 1]} : vector<1x96xf32> to vector<1x32xf32>
    %160 = vector.extract_strided_slice %157 {offsets = [0, 64], sizes = [1, 32], strides = [1, 1]} : vector<1x96xf32> to vector<1x32xf32>
    %161 = vector.extract_strided_slice %151 {offsets = [0, 96], sizes = [1, 32], strides = [1, 1]} : vector<1x128xf32> to vector<1x32xf32>
    %162 = math.tanh %161 : vector<1x32xf32>
    %163 = arith.mulf %159, %142 : vector<1x32xf32>
    %164 = arith.mulf %158, %162 : vector<1x32xf32>
    %165 = arith.addf %163, %164 : vector<1x32xf32>
    %166 = math.tanh %165 : vector<1x32xf32>
    %167 = arith.mulf %160, %166 : vector<1x32xf32>
    %168 = arith.index_cast %c6_i32 : i32 to index
    %c0_50 = arith.constant 0 : index
    %169 = vector.load %arg10[%168, %c0_50] : memref<8x32xf32, #tpu.memory_space<vmem>>, vector<1x32xf32>
    tpu.vector_store %arg10[%168, %c0_50], %167 {strides = array<i32>} : memref<8x32xf32, #tpu.memory_space<vmem>>, vector<1x32xf32>,
    %c7_i32 = arith.constant 7 : i32
    %170 = arith.index_cast %c7_i32 : i32 to index
    %c0_51 = arith.constant 0 : index
    %171 = vector.load %arg9[%170, %c0_51] : memref<8x128xf32, #tpu.memory_space<vmem>>, vector<1x128xf32>
    %c0_52 = arith.constant 0 : index
    %c0_53 = arith.constant 0 : index
    %172 = vector.load %arg2[%c0_52, %c0_53] : memref<32x128xf32, #tpu.memory_space<vmem>>, vector<32x128xf32>
    %cst_54 = arith.constant dense<0.000000e+00> : vector<1x128xf32>
    %173 = tpu.matmul %167, %172, %cst_54 {dimension_numbers = #tpu.dot_dimension_numbers<[1], [0], [0], [1], [0, 0, 1, 1], [], []>} : vector<1x32xf32>, vector<32x128xf32>, vector<1x128xf32> -> vector<1x128xf32>
    %174 = arith.addf %171, %173 : vector<1x128xf32>
    %175 = vector.extract_strided_slice %174 {offsets = [0, 0], sizes = [1, 96], strides = [1, 1]} : vector<1x128xf32> to vector<1x96xf32>
    %176 = arith.negf %175 : vector<1x96xf32>
    %177 = math.exp %176 : vector<1x96xf32>
    %cst_55 = arith.constant 1.000000e+00 : f32
    %178 = vector.broadcast %cst_55 : f32 to vector<1x96xf32>
    %179 = arith.addf %178, %177 : vector<1x96xf32>
    %180 = arith.divf %178, %179 : vector<1x96xf32>
    %181 = vector.extract_strided_slice %180 {offsets = [0, 0], sizes = [1, 32], strides = [1, 1]} : vector<1x96xf32> to vector<1x32xf32>
    %182 = vector.extract_strided_slice %180 {offsets = [0, 32], sizes = [1, 32], strides = [1, 1]} : vector<1x96xf32> to vector<1x32xf32>
    %183 = vector.extract_strided_slice %180 {offsets = [0, 64], sizes = [1, 32], strides = [1, 1]} : vector<1x96xf32> to vector<1x32xf32>
    %184 = vector.extract_strided_slice %174 {offsets = [0, 96], sizes = [1, 32], strides = [1, 1]} : vector<1x128xf32> to vector<1x32xf32>
    %185 = math.tanh %184 : vector<1x32xf32>
    %186 = arith.mulf %182, %165 : vector<1x32xf32>
    %187 = arith.mulf %181, %185 : vector<1x32xf32>
    %188 = arith.addf %186, %187 : vector<1x32xf32>
    %189 = math.tanh %188 : vector<1x32xf32>
    %190 = arith.mulf %183, %189 : vector<1x32xf32>
    %191 = arith.index_cast %c7_i32 : i32 to index
    %c0_56 = arith.constant 0 : index
    %192 = vector.load %arg10[%191, %c0_56] : memref<8x32xf32, #tpu.memory_space<vmem>>, vector<1x32xf32>
    tpu.vector_store %arg10[%191, %c0_56], %190 {strides = array<i32>} : memref<8x32xf32, #tpu.memory_space<vmem>>, vector<1x32xf32>,
    %c8_i32 = arith.constant 8 : i32
    %c0_57 = arith.constant 0 : index
    %c0_58 = arith.constant 0 : index
    %193 = vector.load %arg7[%c0_57, %c0_58] : memref<1x32xf32, #tpu.memory_space<vmem>>, vector<1x32xf32>
    tpu.vector_store %arg7[%c0_57, %c0_58], %190 {strides = array<i32>} : memref<1x32xf32, #tpu.memory_space<vmem>>, vector<1x32xf32>,
    %c0_59 = arith.constant 0 : index
    %c0_60 = arith.constant 0 : index
    %194 = vector.load %arg8[%c0_59, %c0_60] : memref<1x32xf32, #tpu.memory_space<vmem>>, vector<1x32xf32>
    tpu.vector_store %arg8[%c0_59, %c0_60], %188 {strides = array<i32>} : memref<1x32xf32, #tpu.memory_space<vmem>>, vector<1x32xf32>,
    %c0_61 = arith.constant 0 : index
    %c0_62 = arith.constant 0 : index
    %195 = vector.load %arg10[%c0_61, %c0_62] : memref<8x32xf32, #tpu.memory_space<vmem>>, vector<8x32xf32>
    %c0_63 = arith.constant 0 : index
    %c0_64 = arith.constant 0 : index
    %196 = vector.load %arg4[%c0_63, %c0_64] : memref<32x128xf32, #tpu.memory_space<vmem>>, vector<32x128xf32>
    %cst_65 = arith.constant dense<0.000000e+00> : vector<8x128xf32>
    %197 = tpu.matmul %195, %196, %cst_65 {dimension_numbers = #tpu.dot_dimension_numbers<[1], [0], [0], [1], [0, 0, 1, 1], [], []>} : vector<8x32xf32>, vector<32x128xf32>, vector<8x128xf32> -> vector<8x128xf32>
    %c0_66 = arith.constant 0 : index
    %c0_67 = arith.constant 0 : index
    %198 = vector.load %arg5[%c0_66, %c0_67] : memref<1x128xf32, #tpu.memory_space<vmem>>, vector<1x128xf32>
    %199 = vector.broadcast %198 : vector<1x128xf32> to vector<8x128xf32>
    %200 = arith.addf %197, %199 : vector<8x128xf32>
    %c0_68 = arith.constant 0 : index
    %c0_69 = arith.constant 0 : index
    %201 = vector.load %arg6[%c0_68, %c0_69] : memref<8x128xf32, #tpu.memory_space<vmem>>, vector<8x128xf32>
    tpu.vector_store %arg6[%c0_68, %c0_69], %200 {strides = array<i32>} : memref<8x128xf32, #tpu.memory_space<vmem>>, vector<8x128xf32>,
    return
  }
}

</mosaic_0001>

<bundles_post_ra>
// kernel: lstm_encoder_forward.1
= control target key start
LH: loop header
LB: loop body
LE: loop exit
PB: predicated region body
PF: predicated region fallthrough
CT: control target
= control target key end

     0   :  { %14 = vsyncpa [#allocation5], 0  ;;  %v1478_v2 = vmov 0.0|0.0   ;;  %vm1479_vm0 = vmmov 0   ;;  %v1480_v4 = vmov 0.0   ;;  %s1717_s0 = inlined_call_operand.vmem [shape: f32[8,16], index: 0, kind: input, shape index: {}]   ;;  %s1718_s1 = inlined_call_operand.vmem [shape: f32[16,128], index: 1, kind: input, shape index: {}]   ;;  %s1719_s2 = inlined_call_operand.vmem [shape: f32[32,128], index: 2, kind: input, shape index: {}]   ;;  %s1720_s3 = inlined_call_operand.vmem [shape: f32[1,128], index: 3, kind: input, shape index: {}]   ;;  %s1721_s4 = inlined_call_operand.vmem [shape: f32[32,128], index: 4, kind: input, shape index: {}]   ;;  %s1722_s5 = inlined_call_operand.vmem [shape: f32[1,128], index: 5, kind: input, shape index: {}]   ;;  %s1723_s6 = inlined_call_operand.hbm [shape: f32[8,128], index: 6, kind: output, shape index: {0}]   ;;  %s1724_s7 = inlined_call_operand.hbm [shape: f32[1,32], index: 7, kind: output, shape index: {1}]   ;;  %s1725_s8 = inlined_call_operand.hbm [shape: f32[1,32], index: 8, kind: output, shape index: {2}]  }
   0x1   :  { %v29_v0 = vld [vmem:[%s1718_s1] sm:$0xff]  ;;  %v30_v1 = vld [vmem:[%s1718_s1 + $0x8] sm:$0xff]  ;;  %1278 = vmatprep.subr.bf16.mxu0 %v1478_v2  ;;  %1176 = vmatprep.mubr.msk.f32.mxu0 %vm1479_vm0, %v1480_v4  ;;  %v116_v7 = vld [vmem:[%s1719_s2 + $0x10] sm:$0xff] }
   0x2   :  { %v1279_v3 = vpack.c.bf16 %v30_v1, %v29_v0  ;;  %v114_v5 = vld [vmem:[%s1719_s2] sm:$0xff]  ;;  %v115_v6 = vld [vmem:[%s1719_s2 + $0x8] sm:$0xff]  ;;  %1281 = vmatprep.subr.bf16.mxu1 %v1478_v2  ;;  %v117_v9 = vld [vmem:[%s1719_s2 + $0x18] sm:$0xff]  ;;  %1187 = vmatprep.mubr.msk.f32.mxu1 %vm1479_vm0, %v1480_v4 }
   0x3   :  { %v1551_v8 = vpack.c.bf16 %v115_v6, %v114_v5 }
   0x4   :  { %15 = vsyncpa [#allocation7], 0  ;;  %1280 = vmatpush3.bf16.msra.mxu0 %v1279_v3  ;;  %v28_v10 = vld [vmem:[%s1717_s0] sm:$0xff]  ;;  %vm38_vm1 = vcmask 130048   ;;  %v1562_v11 = vpack.c.bf16 %v117_v9, %v116_v7  ;;  %s1481_s18 = smov 32   ;;  %vm221_vm2 = vcmask 253952  }
   0x5   :  { %1283 = vmatpush3.bf16.msra.mxu1 %v1551_v8  ;;  %1287 = vmatprep.subr.bf16.mxu0 %v1478_v2  ;;  %v1105_v12 = vld [vmem:[%s1720_s3] ss:$0 sm:$0xff]  ;;  %s1482_s3 = smov 64   ;;  %vm118_vm3 = vcmask 261120   ;;  %s1483_s19 = smov 96  }
   0x6   :  { %1284 = vmatprep.subr.bf16.mxu1 %v1478_v2 }
   0x7   :  { %1177 = vmatmul.mubr.msk.f32.vlgmr.msra.gmra.mrb[0].mxu0 %vm38_vm1, %v28_v10 }
   0x8   :  { %1289 = vmatpush3.bf16.msra.mxu0 %v1551_v8  ;;  %1198 = vmatprep.mubr.msk.f32.mxu0 %vm1479_vm0, %v1480_v4 }
   0x9   :  { %1286 = vmatpush3.bf16.msra.mxu1 %v1562_v11  ;;  %1290 = vmatprep.subr.bf16.mxu0 %v1478_v2 }
   0xa   :  { %1293 = vmatprep.subr.bf16.mxu1 %v1478_v2 }
   0xc   :  { %1188 = vmatmul.mubr.f32.vlgmr.msra.gmra.mrb[0].mxu1 %v1480_v4  ;;  %1292 = vmatpush3.bf16.msra.mxu0 %v1562_v11 }
   0xd   :  { %1295 = vmatpush3.bf16.msra.mxu1 %v1551_v8  ;;  %1209 = vmatprep.mubr.msk.f32.mxu1 %vm1479_vm0, %v1480_v4 }
   0xe   :  { %1296 = vmatprep.subr.bf16.mxu1 %v1478_v2  ;;  %1299 = vmatprep.subr.bf16.mxu0 %v1478_v2 }
  0x11   :  { %1298 = vmatpush3.bf16.msra.mxu1 %v1562_v11 }
  0x12   :  { %1305 = vmatprep.subr.bf16.mxu1 %v1478_v2 }
  0xda   :  { %v108_v13 = vpop.f32.mrb[0].mxu0 }
  0xdb   :  { %v109_v14 = vadd.f32 %v1105_v12, %v108_v13  ;;  %v1178_v15 = vpop.f32.mrb[1].mxu0 }
  0xdd   :  { %112 = vst [vmem:[#allocation2] sm:$0xff] %v109_v14 }
  0xdf   :  { %v188_v16 = vpop.f32.mrb[0].mxu1 }
  0xe0   :  { %v1189_v17 = vpop.f32.mrb[1].mxu1 }
  0xe4   :  { %v113_v18 = vld [vmem:[#allocation2] sm:$0x1]  ;;  %v223_v34 = vld [vmem:[#allocation2 + $0x1] sm:$0x1]  ;;  %v330_v52 = vld [vmem:[#allocation2 + $0x2] sm:$0x1] }
  0xe5   :  { %v192_v19 = vadd.f32 %v188_v16, %v113_v18  ;;  %v437_v9 = vld [vmem:[#allocation2 + $0x3] sm:$0x1] }
  0xe7   :  { %1344 = vtanh.f32 %v192_v19  ;;  %v1107_v21 = vmul.f32 -1.442695, %v192_v19 }
  0xe9   :  { %1346 = vpow2.f32 %v1107_v21 }
  0xf1   :  { %v1345_v20 = vpop.eup %1344 }
  0xf2   :  { %202 = vrot.lane.b32.xlu0 %v1345_v20, %s1481_s18 }
  0xf3   :  { %v1347_v22 = vpop.eup %1346 }
  0xf4   :  { %v196_v23 = vadd.f32 1.0, %v1347_v22 }
  0xf6   :  { %1348 = vrcp.f32 %v196_v23 }
 0x100   :  { %v1349_v24 = vpop.eup %1348 }
 0x101   :  { %v200_v27 = vmul.f32 0.0, %v1349_v24 }
 0x164   :  { %v203_v25 = vpop.permute.xlu0 %202 }
 0x165   :  { %v205_v26 = vmul.f32 %v1349_v24, %v203_v25 }
 0x167   :  { %207 = vrot.lane.b32.xlu0 %v205_v26, %s1481_s18 }
 0x1d9   :  { %v208_v28 = vpop.permute.xlu0 %207 }
 0x1da   :  { %v210_v29 = vadd.f32 %v208_v28, %v200_v27  ;;  %v544_v28 = vld [vmem:[#allocation2 + $0x4] sm:$0x1] }
 0x1dc   :  { %1350 = vtanh.f32 %v210_v29 }
 0x1e6   :  { %v1351_v30 = vpop.eup %1350 }
 0x1e7   :  { %213 = vrot.lane.b32.xlu1 %v1351_v30, %s1481_s18 }
 0x259   :  { %v214_v31 = vpop.permute.xlu1 %213 }
 0x25a   :  { %v216_v32 = vmul.f32 %v1349_v24, %v214_v31 }
 0x25c   :  { %218 = vrot.lane.b32.xlu1 %v216_v32, %s1482_s3 }
 0x2ce   :  { %v219_v33 = vpop.permute.xlu1 %218 }
 0x2cf   :  { %222 = vst.msk [vmem:[#allocation3] sm:$0x1] %vm221_vm2, %v219_v33  ;;  %1199 = vmatmul.mubr.msk.f32.vlgmr.msra.gmra.mrb[2].mxu0 %vm118_vm3, %v219_v33 }
 0x2d0   :  { %1301 = vmatpush3.bf16.msra.mxu0 %v1551_v8  ;;  %1220 = vmatprep.mubr.msk.f32.mxu0 %vm1479_vm0, %v1480_v4 }
 0x2d1   :  { %1302 = vmatprep.subr.bf16.mxu0 %v1478_v2 }
 0x2d4   :  { %1304 = vmatpush3.bf16.msra.mxu0 %v1562_v11 }
 0x2d5   :  { %1311 = vmatprep.subr.bf16.mxu0 %v1478_v2 }
 0x3a2   :  { %v296_v35 = vpop.f32.mrb[2].mxu0 }
 0x3a3   :  { %v300_v36 = vadd.f32 %v296_v35, %v223_v34  ;;  %v1200_v37 = vpop.f32.mrb[3].mxu0 }
 0x3a5   :  { %1352 = vtanh.f32 %v300_v36  ;;  %v1109_v39 = vmul.f32 -1.442695, %v300_v36 }
 0x3a7   :  { %1354 = vpow2.f32 %v1109_v39 }
 0x3af   :  { %v1353_v38 = vpop.eup %1352 }
 0x3b0   :  { %310 = vrot.lane.b32.xlu0 %v1353_v38, %s1481_s18 }
 0x3b1   :  { %v1355_v40 = vpop.eup %1354 }
 0x3b2   :  { %v304_v41 = vadd.f32 1.0, %v1355_v40 }
 0x3b4   :  { %1356 = vrcp.f32 %v304_v41 }
 0x3be   :  { %v1357_v42 = vpop.eup %1356 }
 0x3bf   :  { %v308_v45 = vmul.f32 %v1357_v42, %v210_v29 }
 0x422   :  { %v311_v43 = vpop.permute.xlu0 %310 }
 0x423   :  { %v313_v44 = vmul.f32 %v1357_v42, %v311_v43 }
 0x425   :  { %315 = vrot.lane.b32.xlu1 %v313_v44, %s1481_s18 }
 0x497   :  { %v316_v46 = vpop.permute.xlu1 %315 }
 0x498   :  { %v318_v47 = vadd.f32 %v316_v46, %v308_v45  ;;  %v651_v46 = vld [vmem:[#allocation2 + $0x5] sm:$0x1] }
 0x49a   :  { %1358 = vtanh.f32 %v318_v47 }
 0x4a4   :  { %v1359_v48 = vpop.eup %1358 }
 0x4a5   :  { %321 = vrot.lane.b32.xlu0 %v1359_v48, %s1481_s18 }
 0x517   :  { %v322_v49 = vpop.permute.xlu0 %321 }
 0x518   :  { %v324_v50 = vmul.f32 %v1357_v42, %v322_v49 }
 0x51a   :  { %326 = vrot.lane.b32.xlu1 %v324_v50, %s1482_s3 }
 0x58c   :  { %v327_v51 = vpop.permute.xlu1 %326 }
 0x58d   :  { %329 = vst.msk [vmem:[#allocation3 + $0x1] sm:$0x1] %vm221_vm2, %v327_v51  ;;  %1210 = vmatmul.mubr.msk.f32.vlgmr.msra.gmra.mrb[2].mxu1 %vm118_vm3, %v327_v51 }
 0x58e   :  { %1307 = vmatpush3.bf16.msra.mxu1 %v1551_v8  ;;  %1231 = vmatprep.mubr.msk.f32.mxu1 %vm1479_vm0, %v1480_v4 }
 0x58f   :  { %1308 = vmatprep.subr.bf16.mxu1 %v1478_v2 }
 0x592   :  { %1310 = vmatpush3.bf16.msra.mxu1 %v1562_v11 }
 0x593   :  { %1317 = vmatprep.subr.bf16.mxu1 %v1478_v2 }
 0x660   :  { %v403_v53 = vpop.f32.mrb[2].mxu1 }
 0x661   :  { %v407_v54 = vadd.f32 %v403_v53, %v330_v52  ;;  %v1211_v55 = vpop.f32.mrb[3].mxu1 }
 0x663   :  { %1360 = vtanh.f32 %v407_v54  ;;  %v1111_v57 = vmul.f32 -1.442695, %v407_v54 }
 0x665   :  { %1362 = vpow2.f32 %v1111_v57 }
 0x66d   :  { %v1361_v56 = vpop.eup %1360 }
 0x66e   :  { %417 = vrot.lane.b32.xlu0 %v1361_v56, %s1481_s18 }
 0x66f   :  { %v1363_v58 = vpop.eup %1362 }
 0x670   :  { %v411_v59 = vadd.f32 1.0, %v1363_v58 }
 0x672   :  { %1364 = vrcp.f32 %v411_v59 }
 0x67c   :  { %v1365_v60 = vpop.eup %1364 }
 0x67d   :  { %v415_v63 = vmul.f32 %v1365_v60, %v318_v47 }
 0x6e0   :  { %v418_v61 = vpop.permute.xlu0 %417 }
 0x6e1   :  { %v420_v62 = vmul.f32 %v1365_v60, %v418_v61 }
 0x6e3   :  { %422 = vrot.lane.b32.xlu1 %v420_v62, %s1481_s18  ;;  %v758_v62 = vld [vmem:[#allocation2 + $0x6] sm:$0x1] }
 0x755   :  { %v423_v0 = vpop.permute.xlu1 %422 }
 0x756   :  { %v425_v1 = vadd.f32 %v423_v0, %v415_v63 }
 0x758   :  { %1366 = vtanh.f32 %v425_v1 }
 0x762   :  { %v1367_v3 = vpop.eup %1366 }
 0x763   :  { %428 = vrot.lane.b32.xlu0 %v1367_v3, %s1481_s18 }
 0x7d5   :  { %v429_v5 = vpop.permute.xlu0 %428 }
 0x7d6   :  { %v431_v6 = vmul.f32 %v1365_v60, %v429_v5 }
 0x7d8   :  { %433 = vrot.lane.b32.xlu1 %v431_v6, %s1482_s3 }
 0x84a   :  { %v434_v7 = vpop.permute.xlu1 %433 }
 0x84b   :  { %436 = vst.msk [vmem:[#allocation3 + $0x2] sm:$0x1] %vm221_vm2, %v434_v7  ;;  %1221 = vmatmul.mubr.msk.f32.vlgmr.msra.gmra.mrb[4].mxu0 %vm118_vm3, %v434_v7 }
 0x84c   :  { %1313 = vmatpush3.bf16.msra.mxu0 %v1551_v8  ;;  %1242 = vmatprep.mubr.msk.f32.mxu0 %vm1479_vm0, %v1480_v4 }
 0x84d   :  { %1314 = vmatprep.subr.bf16.mxu0 %v1478_v2 }
 0x850   :  { %1316 = vmatpush3.bf16.msra.mxu0 %v1562_v11 }
 0x851   :  { %1323 = vmatprep.subr.bf16.mxu0 %v1478_v2 }
 0x91e   :  { %v510_v10 = vpop.f32.mrb[4].mxu0 }
 0x91f   :  { %v514_v12 = vadd.f32 %v510_v10, %v437_v9  ;;  %v1222_v13 = vpop.f32.mrb[5].mxu0 }
 0x921   :  { %1368 = vtanh.f32 %v514_v12  ;;  %v1113_v15 = vmul.f32 -1.442695, %v514_v12 }
 0x923   :  { %1370 = vpow2.f32 %v1113_v15 }
 0x92b   :  { %v1369_v14 = vpop.eup %1368 }
 0x92c   :  { %524 = vrot.lane.b32.xlu0 %v1369_v14, %s1481_s18 }
 0x92d   :  { %v1371_v16 = vpop.eup %1370 }
 0x92e   :  { %v518_v17 = vadd.f32 1.0, %v1371_v16 }
 0x930   :  { %1372 = vrcp.f32 %v518_v17 }
 0x93a   :  { %v1373_v18 = vpop.eup %1372 }
 0x93b   :  { %v522_v21 = vmul.f32 %v1373_v18, %v425_v1 }
 0x99e   :  { %v525_v19 = vpop.permute.xlu0 %524 }
 0x99f   :  { %v527_v20 = vmul.f32 %v1373_v18, %v525_v19  ;;  %v865_v19 = vld [vmem:[#allocation2 + $0x7] sm:$0x1] }
 0x9a1   :  { %529 = vrot.lane.b32.xlu1 %v527_v20, %s1481_s18 }
 0xa13   :  { %v530_v22 = vpop.permute.xlu1 %529 }
 0xa14   :  { %v532_v23 = vadd.f32 %v530_v22, %v522_v21 }
 0xa16   :  { %1374 = vtanh.f32 %v532_v23 }
 0xa20   :  { %v1375_v24 = vpop.eup %1374 }
 0xa21   :  { %535 = vrot.lane.b32.xlu0 %v1375_v24, %s1481_s18 }
 0xa93   :  { %v536_v25 = vpop.permute.xlu0 %535 }
 0xa94   :  { %v538_v26 = vmul.f32 %v1373_v18, %v536_v25 }
 0xa96   :  { %540 = vrot.lane.b32.xlu1 %v538_v26, %s1482_s3 }
 0xb08   :  { %v541_v27 = vpop.permute.xlu1 %540 }
 0xb09   :  { %543 = vst.msk [vmem:[#allocation3 + $0x3] sm:$0x1] %vm221_vm2, %v541_v27  ;;  %1232 = vmatmul.mubr.msk.f32.vlgmr.msra.gmra.mrb[4].mxu1 %vm118_vm3, %v541_v27 }
 0xb0a   :  { %1319 = vmatpush3.bf16.msra.mxu1 %v1551_v8  ;;  %1253 = vmatprep.mubr.msk.f32.mxu1 %vm1479_vm0, %v1480_v4 }
 0xb0b   :  { %1320 = vmatprep.subr.bf16.mxu1 %v1478_v2 }
 0xb0e   :  { %1322 = vmatpush3.bf16.msra.mxu1 %v1562_v11 }
 0xb0f   :  { %1329 = vmatprep.subr.bf16.mxu1 %v1478_v2 }
 0xbdc   :  { %v617_v29 = vpop.f32.mrb[4].mxu1 }
 0xbdd   :  { %v621_v30 = vadd.f32 %v617_v29, %v544_v28  ;;  %v1233_v31 = vpop.f32.mrb[5].mxu1 }
 0xbdf   :  { %1376 = vtanh.f32 %v621_v30  ;;  %v1115_v33 = vmul.f32 -1.442695, %v621_v30 }
 0xbe1   :  { %1378 = vpow2.f32 %v1115_v33 }
 0xbe9   :  { %v1377_v32 = vpop.eup %1376 }
 0xbea   :  { %631 = vrot.lane.b32.xlu0 %v1377_v32, %s1481_s18 }
 0xbeb   :  { %v1379_v34 = vpop.eup %1378 }
 0xbec   :  { %v625_v35 = vadd.f32 1.0, %v1379_v34  ;;  %v979_v34 = vld [vmem:[%s1721_s4] sm:$0xff] }
 0xbee   :  { %1380 = vrcp.f32 %v625_v35  ;;  %v980_v35 = vld [vmem:[%s1721_s4 + $0x8] sm:$0xff] }
 0xbf8   :  { %v1381_v36 = vpop.eup %1380 }
 0xbf9   :  { %v629_v39 = vmul.f32 %v1381_v36, %v532_v23 }
 0xc5c   :  { %v632_v37 = vpop.permute.xlu0 %631 }
 0xc5d   :  { %v634_v38 = vmul.f32 %v1381_v36, %v632_v37  ;;  %v1330_v37 = vpack.c.bf16 %v980_v35, %v979_v34 }
 0xc5f   :  { %636 = vrot.lane.b32.xlu1 %v634_v38, %s1481_s18  ;;  %v982_v38 = vld [vmem:[%s1721_s4 + $0x18] sm:$0xff] }
 0xcd1   :  { %v637_v40 = vpop.permute.xlu1 %636 }
 0xcd2   :  { %v639_v41 = vadd.f32 %v637_v40, %v629_v39 }
 0xcd4   :  { %1382 = vtanh.f32 %v639_v41 }
 0xcde   :  { %v1383_v42 = vpop.eup %1382 }
 0xcdf   :  { %642 = vrot.lane.b32.xlu0 %v1383_v42, %s1481_s18 }
 0xd51   :  { %v643_v43 = vpop.permute.xlu0 %642 }
 0xd52   :  { %v645_v44 = vmul.f32 %v1381_v36, %v643_v43  ;;  %v981_v36 = vld [vmem:[%s1721_s4 + $0x10] sm:$0xff]  ;;  %s1484_s4 = smov [#allocation6]  }
 0xd53   :  { %v1333_v39 = vpack.c.bf16 %v982_v38, %v981_v36  ;;  %s1080_s28 = sshll.u32 %s1484_s4, 4  ;;  %s1081_s28 = int_to_ptr.vmem [resolvable:$true] %s1080_s28 }
 0xd54   :  { %647 = vrot.lane.b32.xlu1 %v645_v44, %s1482_s3  ;;  %s1408_s29 = scalar_lea.vmem %s1081_s28, 16  ;;  %s1412_s30 = scalar_lea.vmem %s1081_s28, 32 }
 0xd55   :  { %p1409_p0 = scmp.ne.s32.totalorder %s1081_s28, %s1408_s29  ;;  %p1413_p1 = scmp.lt.s32.totalorder %s1081_s28, %s1081_s28 }
 0xd56   :  { %p1414_p2 = scmp.lt.s32.totalorder %s1412_s30, %s1408_s29 }
 0xd58   :  { %p1415_p3 = por %p1414_p2, %p1413_p1 }
 0xd5a   :  { %p1416_p4 = pnand %p1415_p3, %p1409_p0 }
 0xdc6   :  { %v648_v45 = vpop.permute.xlu1 %647 }
 0xdc7   :  { %650 = vst.msk [vmem:[#allocation3 + $0x4] sm:$0x1] %vm221_vm2, %v648_v45  ;;  %1243 = vmatmul.mubr.msk.f32.vlgmr.msra.gmra.mrb[6].mxu0 %vm118_vm3, %v648_v45 }
 0xdc8   :  { %1325 = vmatpush3.bf16.msra.mxu0 %v1551_v8  ;;  %1264 = vmatprep.mubr.msk.f32.mxu0 %vm1479_vm0, %v1480_v4 }
 0xdc9   :  { %1326 = vmatprep.subr.bf16.mxu0 %v1478_v2 }
 0xdcc   :  { %1328 = vmatpush3.bf16.msra.mxu0 %v1562_v11 }
 0xe9a   :  { %v724_v47 = vpop.f32.mrb[6].mxu0 }
 0xe9b   :  { %v728_v48 = vadd.f32 %v724_v47, %v651_v46  ;;  %v1244_v49 = vpop.f32.mrb[7].mxu0 }
 0xe9d   :  { %1384 = vtanh.f32 %v728_v48  ;;  %v1117_v51 = vmul.f32 -1.442695, %v728_v48 }
 0xe9f   :  { %1386 = vpow2.f32 %v1117_v51 }
 0xea7   :  { %v1385_v50 = vpop.eup %1384 }
 0xea8   :  { %738 = vrot.lane.b32.xlu0 %v1385_v50, %s1481_s18 }
 0xea9   :  { %v1387_v52 = vpop.eup %1386 }
 0xeaa   :  { %v732_v53 = vadd.f32 1.0, %v1387_v52 }
 0xeac   :  { %1388 = vrcp.f32 %v732_v53 }
 0xeb6   :  { %v1389_v8 = vpop.eup %1388 }
 0xeb7   :  { %v736_v56 = vmul.f32 %v1389_v8, %v639_v41 }
 0xf1a   :  { %v739_v54 = vpop.permute.xlu0 %738 }
 0xf1b   :  { %v741_v55 = vmul.f32 %v1389_v8, %v739_v54 }
 0xf1d   :  { %743 = vrot.lane.b32.xlu1 %v741_v55, %s1481_s18 }
 0xf8f   :  { %v744_v11 = vpop.permute.xlu1 %743 }
 0xf90   :  { %v746_v57 = vadd.f32 %v744_v11, %v736_v56 }
 0xf92   :  { %1390 = vtanh.f32 %v746_v57 }
 0xf9c   :  { %v1391_v58 = vpop.eup %1390 }
 0xf9d   :  { %749 = vrot.lane.b32.xlu0 %v1391_v58, %s1481_s18 }
0x100f   :  { %v750_v59 = vpop.permute.xlu0 %749 }
0x1010   :  { %v752_v60 = vmul.f32 %v1389_v8, %v750_v59 }
0x1012   :  { %754 = vrot.lane.b32.xlu1 %v752_v60, %s1482_s3 }
0x1084   :  { %v755_v61 = vpop.permute.xlu1 %754 }
0x1085   :  { %757 = vst.msk [vmem:[#allocation3 + $0x5] sm:$0x1] %vm221_vm2, %v755_v61  ;;  %1254 = vmatmul.mubr.msk.f32.vlgmr.msra.gmra.mrb[6].mxu1 %vm118_vm3, %v755_v61 }
0x1086   :  { %1275 = vmatprep.mubr.msk.f32.mxu1 %vm1479_vm0, %v1480_v4  ;;  %1331 = vmatpush3.bf16.msra.mxu1 %v1330_v37 }
0x1087   :  { %1332 = vmatprep.subr.bf16.mxu1 %v1478_v2 }
0x108a   :  { %1334 = vmatpush3.bf16.msra.mxu1 %v1333_v39 }
0x1158   :  { %v831_v63 = vpop.f32.mrb[6].mxu1 }
0x1159   :  { %v835_v0 = vadd.f32 %v831_v63, %v758_v62  ;;  %v1255_v1 = vpop.f32.mrb[7].mxu1 }
0x115b   :  { %1392 = vtanh.f32 %v835_v0  ;;  %v1119_v5 = vmul.f32 -1.442695, %v835_v0 }
0x115d   :  { %1394 = vpow2.f32 %v1119_v5 }
0x1165   :  { %v1393_v3 = vpop.eup %1392 }
0x1166   :  { %845 = vrot.lane.b32.xlu0 %v1393_v3, %s1481_s18 }
0x1167   :  { %v1395_v6 = vpop.eup %1394 }
0x1168   :  { %v839_v7 = vadd.f32 1.0, %v1395_v6 }
0x116a   :  { %1396 = vrcp.f32 %v839_v7 }
0x1174   :  { %v1397_v9 = vpop.eup %1396 }
0x1175   :  { %v843_v13 = vmul.f32 %v1397_v9, %v746_v57 }
0x11d8   :  { %v846_v10 = vpop.permute.xlu0 %845 }
0x11d9   :  { %v848_v12 = vmul.f32 %v1397_v9, %v846_v10 }
0x11db   :  { %850 = vrot.lane.b32.xlu1 %v848_v12, %s1481_s18 }
0x124d   :  { %v851_v4 = vpop.permute.xlu1 %850 }
0x124e   :  { %v853_v14 = vadd.f32 %v851_v4, %v843_v13 }
0x1250   :  { %1398 = vtanh.f32 %v853_v14 }
0x125a   :  { %v1399_v15 = vpop.eup %1398 }
0x125b   :  { %856 = vrot.lane.b32.xlu0 %v1399_v15, %s1481_s18 }
0x12cd   :  { %v857_v16 = vpop.permute.xlu0 %856 }
0x12ce   :  { %v859_v17 = vmul.f32 %v1397_v9, %v857_v16 }
0x12d0   :  { %861 = vrot.lane.b32.xlu1 %v859_v17, %s1482_s3 }
0x1342   :  { %v862_v18 = vpop.permute.xlu1 %861 }
0x1343   :  { %864 = vst.msk [vmem:[#allocation3 + $0x6] sm:$0x1] %vm221_vm2, %v862_v18  ;;  %1265 = vmatmul.mubr.msk.f32.vlgmr.msra.gmra.mrb[8].mxu0 %vm118_vm3, %v862_v18 }
0x1416   :  { %v938_v20 = vpop.f32.mrb[8].mxu0 }
0x1417   :  { %v942_v21 = vadd.f32 %v938_v20, %v865_v19  ;;  %v1266_v22 = vpop.f32.mrb[9].mxu0 }
0x1419   :  { %1400 = vtanh.f32 %v942_v21  ;;  %v1121_v24 = vmul.f32 -1.442695, %v942_v21 }
0x141b   :  { %1402 = vpow2.f32 %v1121_v24 }
0x1423   :  { %v1401_v23 = vpop.eup %1400 }
0x1424   :  { %952 = vrot.lane.b32.xlu0 %v1401_v23, %s1481_s18 }
0x1425   :  { %v1403_v25 = vpop.eup %1402 }
0x1426   :  { %v946_v26 = vadd.f32 1.0, %v1403_v25 }
0x1428   :  { %1404 = vrcp.f32 %v946_v26 }
0x1432   :  { %v1405_v27 = vpop.eup %1404 }
0x1433   :  { %v950_v30 = vmul.f32 %v1405_v27, %v853_v14 }
0x1496   :  { %v953_v28 = vpop.permute.xlu0 %952 }
0x1497   :  { %v955_v29 = vmul.f32 %v1405_v27, %v953_v28 }
0x1499   :  { %957 = vrot.lane.b32.xlu1 %v955_v29, %s1481_s18 }
0x150b   :  { %v958_v31 = vpop.permute.xlu1 %957 }
0x150c   :  { %v960_v32 = vadd.f32 %v958_v31, %v950_v30 }
0x150e   :  { %1406 = vtanh.f32 %v960_v32 }
0x1518   :  { %v1407_v33 = vpop.eup %1406 }
0x1519   :  { %963 = vrot.lane.b32.xlu0 %v1407_v33, %s1481_s18 }
0x151d   :  { %974 = vrot.lane.b32.xlu0 %v960_v32, %s1483_s19 }
0x158b   :  { %v964_v40 = vpop.permute.xlu0 %963 }
0x158c   :  { %v966_v41 = vmul.f32 %v1405_v27, %v964_v40 }
0x158e   :  { %968 = vrot.lane.b32.xlu1 %v966_v41, %s1482_s3 }
0x158f   :  { %v975_v42 = vpop.permute.xlu0 %974 }
0x1590   :  { %977 = vst.msk [vmem:[#allocation8] sm:$0x1] %vm221_vm2, %v975_v42 }
0x1600   :  { %v969_v43 = vpop.permute.xlu1 %968 }
0x1601   :  { %971 = vst.msk [vmem:[#allocation3 + $0x7] sm:$0x1] %vm221_vm2, %v969_v43  ;;  %972 = vst.msk [vmem:[#allocation6] sm:$0x1] %vm221_vm2, %v969_v43 }
0x1608   :  { %v978_v44 = vld [vmem:[#allocation3] sm:$0xff] }
0x1609   :  { %1276 = vmatmul.mubr.msk.f32.vlgmr.msra.gmra.mrb[8].mxu1 %vm118_vm3, %v978_v44 }
0x160a   :  { %1419 = shalt.err (!%p1416_p4)
}
0x160b   :  { %s1420_s11 = scalar_lea.hbm %s1724_s7, 16 }
0x160c   :  { %p1421_p5 = scmp.ne.s32.totalorder %s1724_s7, %s1420_s11  ;;  %p1424_p6 = scmp.lt.u32.totalorder %s1420_s11, %s1724_s7 }
0x160e   :  { %p1426_p7 = pnand %p1424_p6, %p1421_p5 }
0x1610   :  { %1429 = shalt.err (!%p1426_p7)
}
0x1611   :  { %1083 = dma.vmem_to_hbm [thread:$0]  %s1081_s28, 16, %s1724_s7, [#allocation7]  }
0x1612   :  { %s1485_s17 = smov [#allocation8]  }
0x1613   :  { %s1090_s0 = sshll.u32 %s1485_s17, 4  ;;  %s1091_s0 = int_to_ptr.vmem [resolvable:$true] %s1090_s0 }
0x1614   :  { %s1430_s2 = scalar_lea.vmem %s1091_s0, 16  ;;  %s1434_s18 = scalar_lea.vmem %s1091_s0, 32 }
0x1615   :  { %p1431_p8 = scmp.ne.s32.totalorder %s1091_s0, %s1430_s2  ;;  %p1435_p9 = scmp.lt.s32.totalorder %s1091_s0, %s1091_s0 }
0x1616   :  { %p1436_p10 = scmp.lt.s32.totalorder %s1434_s18, %s1430_s2 }
0x1618   :  { %p1437_p11 = por %p1436_p10, %p1435_p9 }
0x161a   :  { %p1438_p12 = pnand %p1437_p11, %p1431_p8 }
0x161c   :  { %1441 = shalt.err (!%p1438_p12)
}
0x161d   :  { %s1442_s20 = scalar_lea.hbm %s1725_s8, 16 }
0x161e   :  { %p1443_p13 = scmp.ne.s32.totalorder %s1725_s8, %s1442_s20  ;;  %p1446_p0 = scmp.lt.u32.totalorder %s1442_s20, %s1725_s8 }
0x1620   :  { %p1448_p1 = pnand %p1446_p0, %p1443_p13 }
0x1622   :  { %1451 = shalt.err (!%p1448_p1)
}
0x1623   :  { %1093 = dma.vmem_to_hbm [thread:$0]  %s1091_s0, 16, %s1725_s8, [#allocation7]   ;;  %v1122_v2 = vld [vmem:[%s1722_s5] ss:$0 sm:$0xff] }
0x1624   :  { %s1486_s4 = smov [#allocation4]  }
0x1625   :  { %s1070_s28 = sshll.u32 %s1486_s4, 4  ;;  %s1071_s28 = int_to_ptr.vmem [resolvable:$true] %s1070_s28 }
0x1626   :  { %s1452_s29 = scalar_lea.vmem %s1071_s28, 128  ;;  %p1457_p3 = scmp.lt.s32.totalorder %s1071_s28, %s1071_s28 }
0x1627   :  { %p1453_p2 = scmp.ne.s32.totalorder %s1071_s28, %s1452_s29  ;;  %p1458_p4 = scmp.lt.s32.totalorder %s1452_s29, %s1452_s29 }
0x1629   :  { %p1459_p5 = por %p1458_p4, %p1457_p3 }
0x162b   :  { %p1460_p6 = pnand %p1459_p5, %p1453_p2 }
0x16dc   :  { %v1059_v45 = vpop.f32.mrb[8].mxu1 }
0x16dd   :  { %v1060_v46 = vadd.f32 %v1122_v2, %v1059_v45  ;;  %v1277_v47 = vpop.f32.mrb[9].mxu1 }
0x16df   :  { %1063 = vst [vmem:[#allocation4] sm:$0xff] %v1060_v46 }
0x16e0   :  { %1463 = shalt.err (!%p1460_p6)
}
0x16e1   :  { %s1464_s9 = scalar_lea.hbm %s1723_s6, 128 }
0x16e2   :  { %p1465_p7 = scmp.ne.s32.totalorder %s1723_s6, %s1464_s9  ;;  %p1468_p8 = scmp.lt.u32.totalorder %s1464_s9, %s1723_s6 }
0x16e4   :  { %p1470_p9 = pnand %p1468_p8, %p1465_p7 }
0x16e6   :  { %1473 = shalt.err (!%p1470_p9)
}
0x16e7   :  { %1073 = dma.vmem_to_hbm [thread:$0]  %s1071_s28, 128, %s1723_s6, [#allocation5]  }
0x16e8   :  { %1474 = dma.done.wait [#allocation5], 128  }
0x16e9   :  { %1475 = vsyncadd [#allocation5], 4294967168 }
0x16ea   :  { %1476 = dma.done.wait [#allocation7], 32  }
0x16eb   :  { %1477 = vsyncadd [#allocation7], 4294967264 }
0x16ec   :  { %1103 = vsyncpa [#allocation5], 1 }
0x16ed   :  { %1104 = vsyncpa [#allocation7], 1 }

</bundles_post_ra>
